<compile_context>
chip_gen: v6e
topology: v6e:2x2x1
jax: 0.10.0
libtpu: 0.0.40
codegen_flags: <defaults>
</compile_context>

<pallas_src>
import functools

import jax
import jax.numpy as jnp
from jax import lax
from jax.experimental import pallas as pl
from jax.experimental.pallas import tpu as pltpu


def _gqa_attention_kernel(x_ref, ctx_ref, wq_ref, wkv_ref, wo_ref, bo_ref,
                          o_ref, merged_ref, *, B, Sq, Skv,
                          n_q_heads, n_kv_heads, head_dim):
    x = x_ref[...]      # (B*Sq, q_dim)
    ctx = ctx_ref[...]  # (B*Skv, c_dim)

    # Fused projections over all batch rows and all heads
    # (softmax scale already folded into wq at param-prep time).
    q = jnp.dot(x, wq_ref[...], preferred_element_type=jnp.float32)      # (B*Sq, Hq*hd)
    kv = jnp.dot(ctx, wkv_ref[...], preferred_element_type=jnp.float32)  # (B*Skv, 2*Hkv*hd)

    kv_inner = n_kv_heads * head_dim
    group = n_q_heads // n_kv_heads

    for b in range(B):                      # unrolled: static slices are free
        q_b = q[b * Sq:(b + 1) * Sq, :]     # (Sq, Hq*hd)
        kv_b = kv[b * Skv:(b + 1) * Skv, :]  # (Skv, 2*Hkv*hd)
        for g in range(n_kv_heads):
            k_g = kv_b[:, g * head_dim:(g + 1) * head_dim]                   # (Skv, hd)
            v_g = kv_b[:, kv_inner + g * head_dim:kv_inner + (g + 1) * head_dim]

            # Stack the `group` query heads sharing this kv head along the
            # sublane axis -> one (group*Sq, hd) tile, so QK^T and P@V are a
            # single MXU matmul per kv group instead of one per query head.
            q_stack = jnp.concatenate(
                [q_b[:, (g * group + i) * head_dim:(g * group + i + 1) * head_dim]
                 for i in range(group)], axis=0)                              # (group*Sq, hd)

            # q_stack @ k_g^T without materializing the transpose.
            sim = lax.dot_general(q_stack, k_g, (((1,), (1,)), ((), ())),
                                  preferred_element_type=jnp.float32)         # (group*Sq, Skv)
            sim = sim - jnp.max(sim, axis=-1, keepdims=True)
            p = jnp.exp(sim)
            attn = p / jnp.sum(p, axis=-1, keepdims=True)                     # exact divide
            out_stack = jnp.dot(attn, v_g,
                                preferred_element_type=jnp.float32)           # (group*Sq, hd)

            # Scatter each head's (Sq, hd) slab into its static (row, lane)
            # slot of the merged buffer (no lane-concat chain into wo matmul).
            for i in range(group):
                h = g * group + i
                merged_ref[b * Sq:(b + 1) * Sq,
                           h * head_dim:(h + 1) * head_dim] = (
                    out_stack[i * Sq:(i + 1) * Sq, :])

    # Single fused output projection + bias (added exactly once).
    o_ref[...] = (jnp.dot(merged_ref[...], wo_ref[...],
                          preferred_element_type=jnp.float32) + bo_ref[...])


def prepare_gqa_params(params, *, head_dim):
    """One-time parameter prep, hoisted off the per-call forward path.

    Folds 1/sqrt(head_dim) into Wq, fuses [Wk | Wv] into one lane-wide weight,
    and reshapes the output bias to a broadcastable row.
    """
    scale = float(head_dim) ** -0.5
    q_dim = params["wq"].shape[0]
    return {
        "wq": params["wq"] * scale,                                    # (q_dim, Hq*hd)
        "wkv": jnp.concatenate([params["wk"], params["wv"]], axis=1),  # (c_dim, 2*Hkv*hd)
        "wo": params["wo"],                                            # (Hq*hd, q_dim)
        "bo": params["bo"].reshape(1, q_dim),                          # (1, q_dim)
    }


@functools.partial(jax.jit, static_argnames=("n_q_heads", "n_kv_heads", "head_dim"))
def _gqa_attention_forward_impl(x, context, fused_params, *,
                                n_q_heads, n_kv_heads, head_dim):
    B, Sq, q_dim = x.shape
    _, Skv, c_dim = context.shape
    q_inner = n_q_heads * head_dim

    # Flatten batch wrapper-side (free reshape, fused by jit) so the kernel
    # sees simple 2-D lane/sublane slabs and one matmul covers all rows.
    x2 = x.reshape(B * Sq, q_dim)
    c2 = context.reshape(B * Skv, c_dim)

    kernel = functools.partial(
        _gqa_attention_kernel, B=B, Sq=Sq, Skv=Skv,
        n_q_heads=n_q_heads, n_kv_heads=n_kv_heads, head_dim=head_dim)

    vmem_spec = pl.BlockSpec(memory_space=pltpu.MemorySpace.VMEM)
    out2 = pl.pallas_call(
        kernel,
        out_shape=jax.ShapeDtypeStruct((B * Sq, q_dim), jnp.float32),
        in_specs=[vmem_spec] * 6,
        out_specs=vmem_spec,
        scratch_shapes=[pltpu.VMEM((B * Sq, q_inner), jnp.float32)],
    )(x2, c2, fused_params["wq"], fused_params["wkv"],
      fused_params["wo"], fused_params["bo"])

    return out2.reshape(B, Sq, q_dim)


def gqa_attention_forward(x, context, fused_params, *,
                          n_q_heads, n_kv_heads, head_dim):
    """x: (B, Sq, q_dim), context: (B, Skv, c_dim) or None -> (B, Sq, q_dim)."""
    if context is None:
        context = x
    return _gqa_attention_forward_impl(
        x, context, fused_params,
        n_q_heads=n_q_heads, n_kv_heads=n_kv_heads, head_dim=head_dim)


def gqa_attention_reference(x, context, params, *, n_q_heads, n_kv_heads, head_dim):
    """Plain-JAX reference matching the PyTorch GQAAttention forward (eval mode)."""
    if context is None:
        context = x
    B, Sq, q_dim = x.shape
    scale = float(head_dim) ** -0.5
    q = x @ params["wq"]
    k = context @ params["wk"]
    v = context @ params["wv"]

    def split(t, n):
        b, s, d = t.shape
        return t.reshape(b, s, n, d // n).transpose(0, 2, 1, 3)

    q = split(q, n_q_heads)
    k = split(k, n_kv_heads)
    v = split(v, n_kv_heads)
    if n_kv_heads < n_q_heads:
        rep = n_q_heads // n_kv_heads
        k = jnp.repeat(k, rep, axis=1)   # == torch.repeat_interleave(dim=1)
        v = jnp.repeat(v, rep, axis=1)
    sim = jnp.einsum("bhid,bhjd->bhij", q, k) * scale
    attn = jax.nn.softmax(sim, axis=-1)
    out = jnp.einsum("bhij,bhjd->bhid", attn, v)
    out = out.transpose(0, 2, 1, 3).reshape(B, Sq, n_q_heads * head_dim)
    return out @ params["wo"] + params["bo"]


if __name__ == "__main__":
    # Small shapes consistent with the module (cross-attention, GQA).
    B, Sq, Skv = 2, 8, 16
    q_dim, context_dim = 32, 24
    n_q_heads, n_kv_heads, head_dim = 4, 2, 16
    q_inner = n_q_heads * head_dim
    kv_inner = n_kv_heads * head_dim

    key = jax.random.PRNGKey(0)
    kx, kc, kq, kk, kv, ko, kb = jax.random.split(key, 7)

    x = jax.random.normal(kx, (B, Sq, q_dim), dtype=jnp.float32)
    context = jax.random.normal(kc, (B, Skv, context_dim), dtype=jnp.float32)

    # Deterministic synthetic parameters (stored as (in_dim, out_dim), i.e. W^T
    # of the PyTorch nn.Linear weight).
    raw_params = {
        "wq": jax.random.normal(kq, (q_dim, q_inner), dtype=jnp.float32) * 0.05,
        "wk": jax.random.normal(kk, (context_dim, kv_inner), dtype=jnp.float32) * 0.05,
        "wv": jax.random.normal(kv, (context_dim, kv_inner), dtype=jnp.float32) * 0.05,
        "wo": jax.random.normal(ko, (q_inner, q_dim), dtype=jnp.float32) * 0.05,
        "bo": jax.random.normal(kb, (q_dim,), dtype=jnp.float32) * 0.05,
    }

    # One-time parameter prep (NOT on the per-call forward path).
    fused_params = jax.tree_util.tree_map(
        jax.block_until_ready, prepare_gqa_params(raw_params, head_dim=head_dim))

    out = gqa_attention_forward(
        x, context, fused_params,
        n_q_heads=n_q_heads, n_kv_heads=n_kv_heads, head_dim=head_dim)
    out = jax.block_until_ready(out)

    ref = gqa_attention_reference(
        x, context, raw_params,
        n_q_heads=n_q_heads, n_kv_heads=n_kv_heads, head_dim=head_dim)

    assert out.shape == (B, Sq, q_dim)
    assert jnp.allclose(out, ref, atol=1e-4, rtol=1e-4), (
        f"max abs err = {jnp.max(jnp.abs(out - ref))}")

    print("KERNEL_OK")
</pallas_src>

<mosaic_0001>
module attributes {stable_mosaic.version = 11 : i64} {
  func.func @_gqa_attention_kernel(%arg0: memref<16x32xf32, #tpu.memory_space<vmem>>, %arg1: memref<32x24xf32, #tpu.memory_space<vmem>>, %arg2: memref<32x64xf32, #tpu.memory_space<vmem>>, %arg3: memref<24x64xf32, #tpu.memory_space<vmem>>, %arg4: memref<64x32xf32, #tpu.memory_space<vmem>>, %arg5: memref<1x32xf32, #tpu.memory_space<vmem>>, %arg6: memref<16x32xf32, #tpu.memory_space<vmem>>, %arg7: memref<16x64xf32, #tpu.memory_space<vmem>>) attributes {dimension_semantics = [], scalar_prefetch = 0 : i64, scratch_operands = 1 : i64, tpu.core_type = #tpu.core_type<tc>} {
    %c0 = arith.constant 0 : index
    %c0_0 = arith.constant 0 : index
    %0 = vector.load %arg0[%c0, %c0_0] : memref<16x32xf32, #tpu.memory_space<vmem>>, vector<16x32xf32>
    %c0_1 = arith.constant 0 : index
    %c0_2 = arith.constant 0 : index
    %1 = vector.load %arg1[%c0_1, %c0_2] : memref<32x24xf32, #tpu.memory_space<vmem>>, vector<32x24xf32>
    %c0_3 = arith.constant 0 : index
    %c0_4 = arith.constant 0 : index
    %2 = vector.load %arg2[%c0_3, %c0_4] : memref<32x64xf32, #tpu.memory_space<vmem>>, vector<32x64xf32>
    %cst = arith.constant dense<0.000000e+00> : vector<16x64xf32>
    %3 = tpu.matmul %0, %2, %cst {dimension_numbers = #tpu.dot_dimension_numbers<[1], [0], [0], [1], [0, 0, 1, 1], [], []>} : vector<16x32xf32>, vector<32x64xf32>, vector<16x64xf32> -> vector<16x64xf32>
    %c0_5 = arith.constant 0 : index
    %c0_6 = arith.constant 0 : index
    %4 = vector.load %arg3[%c0_5, %c0_6] : memref<24x64xf32, #tpu.memory_space<vmem>>, vector<24x64xf32>
    %cst_7 = arith.constant dense<0.000000e+00> : vector<32x64xf32>
    %5 = tpu.matmul %1, %4, %cst_7 {dimension_numbers = #tpu.dot_dimension_numbers<[1], [0], [0], [1], [0, 0, 1, 1], [], []>} : vector<32x24xf32>, vector<24x64xf32>, vector<32x64xf32> -> vector<32x64xf32>
    %6 = vector.extract_strided_slice %3 {offsets = [0, 0], sizes = [8, 64], strides = [1, 1]} : vector<16x64xf32> to vector<8x64xf32>
    %7 = vector.extract_strided_slice %5 {offsets = [0, 0], sizes = [16, 64], strides = [1, 1]} : vector<32x64xf32> to vector<16x64xf32>
    %8 = vector.extract_strided_slice %7 {offsets = [0, 0], sizes = [16, 16], strides = [1, 1]} : vector<16x64xf32> to vector<16x16xf32>
    %9 = vector.extract_strided_slice %7 {offsets = [0, 32], sizes = [16, 16], strides = [1, 1]} : vector<16x64xf32> to vector<16x16xf32>
    %10 = vector.extract_strided_slice %6 {offsets = [0, 0], sizes = [8, 16], strides = [1, 1]} : vector<8x64xf32> to vector<8x16xf32>
    %11 = vector.extract_strided_slice %6 {offsets = [0, 16], sizes = [8, 16], strides = [1, 1]} : vector<8x64xf32> to vector<8x16xf32>
    %12 = tpu.concatenate %10, %11 in 0 : vector<8x16xf32>, vector<8x16xf32> -> vector<16x16xf32>
    %cst_8 = arith.constant dense<0.000000e+00> : vector<16x16xf32>
    %13 = tpu.matmul %12, %8, %cst_8 {dimension_numbers = #tpu.dot_dimension_numbers<[1], [1], [0], [0], [0, 0, 1, 0], [], []>} : vector<16x16xf32>, vector<16x16xf32>, vector<16x16xf32> -> vector<16x16xf32>
    %cst_9 = arith.constant dense<0xFF800000> : vector<16xf32>
    %14 = vector.multi_reduction <maximumf>, %13, %cst_9 [1] : vector<16x16xf32> to vector<16xf32>
    %15 = vector.shape_cast %14 : vector<16xf32> to vector<16x1xf32>
    %16 = vector.broadcast %15 : vector<16x1xf32> to vector<16x16xf32>
    %17 = arith.subf %13, %16 : vector<16x16xf32>
    %18 = math.exp %17 : vector<16x16xf32>
    %cst_10 = arith.constant dense<0.000000e+00> : vector<16xf32>
    %19 = vector.multi_reduction <add>, %18, %cst_10 [1] : vector<16x16xf32> to vector<16xf32>
    %20 = vector.shape_cast %19 : vector<16xf32> to vector<16x1xf32>
    %21 = vector.broadcast %20 : vector<16x1xf32> to vector<16x16xf32>
    %22 = arith.divf %18, %21 : vector<16x16xf32>
    %cst_11 = arith.constant dense<0.000000e+00> : vector<16x16xf32>
    %23 = tpu.matmul %22, %9, %cst_11 {dimension_numbers = #tpu.dot_dimension_numbers<[1], [0], [0], [1], [0, 0, 1, 1], [], []>} : vector<16x16xf32>, vector<16x16xf32>, vector<16x16xf32> -> vector<16x16xf32>
    %24 = vector.extract_strided_slice %23 {offsets = [0, 0], sizes = [8, 16], strides = [1, 1]} : vector<16x16xf32> to vector<8x16xf32>
    %c0_12 = arith.constant 0 : index
    %c0_13 = arith.constant 0 : index
    %25 = vector.load %arg7[%c0_12, %c0_13] : memref<16x64xf32, #tpu.memory_space<vmem>>, vector<8x16xf32>
    tpu.vector_store %arg7[%c0_12, %c0_13], %24 {strides = array<i32>} : memref<16x64xf32, #tpu.memory_space<vmem>>, vector<8x16xf32>,
    %26 = vector.extract_strided_slice %23 {offsets = [8, 0], sizes = [8, 16], strides = [1, 1]} : vector<16x16xf32> to vector<8x16xf32>
    %c0_14 = arith.constant 0 : index
    %c16 = arith.constant 16 : index
    %27 = vector.load %arg7[%c0_14, %c16] : memref<16x64xf32, #tpu.memory_space<vmem>>, vector<8x16xf32>
    tpu.vector_store %arg7[%c0_14, %c16], %26 {strides = array<i32>} : memref<16x64xf32, #tpu.memory_space<vmem>>, vector<8x16xf32>,
    %28 = vector.extract_strided_slice %7 {offsets = [0, 16], sizes = [16, 16], strides = [1, 1]} : vector<16x64xf32> to vector<16x16xf32>
    %29 = vector.extract_strided_slice %7 {offsets = [0, 48], sizes = [16, 16], strides = [1, 1]} : vector<16x64xf32> to vector<16x16xf32>
    %30 = vector.extract_strided_slice %6 {offsets = [0, 32], sizes = [8, 16], strides = [1, 1]} : vector<8x64xf32> to vector<8x16xf32>
    %31 = vector.extract_strided_slice %6 {offsets = [0, 48], sizes = [8, 16], strides = [1, 1]} : vector<8x64xf32> to vector<8x16xf32>
    %32 = tpu.concatenate %30, %31 in 0 : vector<8x16xf32>, vector<8x16xf32> -> vector<16x16xf32>
    %cst_15 = arith.constant dense<0.000000e+00> : vector<16x16xf32>
    %33 = tpu.matmul %32, %28, %cst_15 {dimension_numbers = #tpu.dot_dimension_numbers<[1], [1], [0], [0], [0, 0, 1, 0], [], []>} : vector<16x16xf32>, vector<16x16xf32>, vector<16x16xf32> -> vector<16x16xf32>
    %cst_16 = arith.constant dense<0xFF800000> : vector<16xf32>
    %34 = vector.multi_reduction <maximumf>, %33, %cst_16 [1] : vector<16x16xf32> to vector<16xf32>
    %35 = vector.shape_cast %34 : vector<16xf32> to vector<16x1xf32>
    %36 = vector.broadcast %35 : vector<16x1xf32> to vector<16x16xf32>
    %37 = arith.subf %33, %36 : vector<16x16xf32>
    %38 = math.exp %37 : vector<16x16xf32>
    %cst_17 = arith.constant dense<0.000000e+00> : vector<16xf32>
    %39 = vector.multi_reduction <add>, %38, %cst_17 [1] : vector<16x16xf32> to vector<16xf32>
    %40 = vector.shape_cast %39 : vector<16xf32> to vector<16x1xf32>
    %41 = vector.broadcast %40 : vector<16x1xf32> to vector<16x16xf32>
    %42 = arith.divf %38, %41 : vector<16x16xf32>
    %cst_18 = arith.constant dense<0.000000e+00> : vector<16x16xf32>
    %43 = tpu.matmul %42, %29, %cst_18 {dimension_numbers = #tpu.dot_dimension_numbers<[1], [0], [0], [1], [0, 0, 1, 1], [], []>} : vector<16x16xf32>, vector<16x16xf32>, vector<16x16xf32> -> vector<16x16xf32>
    %44 = vector.extract_strided_slice %43 {offsets = [0, 0], sizes = [8, 16], strides = [1, 1]} : vector<16x16xf32> to vector<8x16xf32>
    %c0_19 = arith.constant 0 : index
    %c32 = arith.constant 32 : index
    %45 = vector.load %arg7[%c0_19, %c32] : memref<16x64xf32, #tpu.memory_space<vmem>>, vector<8x16xf32>
    tpu.vector_store %arg7[%c0_19, %c32], %44 {strides = array<i32>} : memref<16x64xf32, #tpu.memory_space<vmem>>, vector<8x16xf32>,
    %46 = vector.extract_strided_slice %43 {offsets = [8, 0], sizes = [8, 16], strides = [1, 1]} : vector<16x16xf32> to vector<8x16xf32>
    %c0_20 = arith.constant 0 : index
    %c48 = arith.constant 48 : index
    %47 = vector.load %arg7[%c0_20, %c48] : memref<16x64xf32, #tpu.memory_space<vmem>>, vector<8x16xf32>
    tpu.vector_store %arg7[%c0_20, %c48], %46 {strides = array<i32>} : memref<16x64xf32, #tpu.memory_space<vmem>>, vector<8x16xf32>,
    %48 = vector.extract_strided_slice %3 {offsets = [8, 0], sizes = [8, 64], strides = [1, 1]} : vector<16x64xf32> to vector<8x64xf32>
    %49 = vector.extract_strided_slice %5 {offsets = [16, 0], sizes = [16, 64], strides = [1, 1]} : vector<32x64xf32> to vector<16x64xf32>
    %50 = vector.extract_strided_slice %49 {offsets = [0, 0], sizes = [16, 16], strides = [1, 1]} : vector<16x64xf32> to vector<16x16xf32>
    %51 = vector.extract_strided_slice %49 {offsets = [0, 32], sizes = [16, 16], strides = [1, 1]} : vector<16x64xf32> to vector<16x16xf32>
    %52 = vector.extract_strided_slice %48 {offsets = [0, 0], sizes = [8, 16], strides = [1, 1]} : vector<8x64xf32> to vector<8x16xf32>
    %53 = vector.extract_strided_slice %48 {offsets = [0, 16], sizes = [8, 16], strides = [1, 1]} : vector<8x64xf32> to vector<8x16xf32>
    %54 = tpu.concatenate %52, %53 in 0 : vector<8x16xf32>, vector<8x16xf32> -> vector<16x16xf32>
    %cst_21 = arith.constant dense<0.000000e+00> : vector<16x16xf32>
    %55 = tpu.matmul %54, %50, %cst_21 {dimension_numbers = #tpu.dot_dimension_numbers<[1], [1], [0], [0], [0, 0, 1, 0], [], []>} : vector<16x16xf32>, vector<16x16xf32>, vector<16x16xf32> -> vector<16x16xf32>
    %cst_22 = arith.constant dense<0xFF800000> : vector<16xf32>
    %56 = vector.multi_reduction <maximumf>, %55, %cst_22 [1] : vector<16x16xf32> to vector<16xf32>
    %57 = vector.shape_cast %56 : vector<16xf32> to vector<16x1xf32>
    %58 = vector.broadcast %57 : vector<16x1xf32> to vector<16x16xf32>
    %59 = arith.subf %55, %58 : vector<16x16xf32>
    %60 = math.exp %59 : vector<16x16xf32>
    %cst_23 = arith.constant dense<0.000000e+00> : vector<16xf32>
    %61 = vector.multi_reduction <add>, %60, %cst_23 [1] : vector<16x16xf32> to vector<16xf32>
    %62 = vector.shape_cast %61 : vector<16xf32> to vector<16x1xf32>
    %63 = vector.broadcast %62 : vector<16x1xf32> to vector<16x16xf32>
    %64 = arith.divf %60, %63 : vector<16x16xf32>
    %cst_24 = arith.constant dense<0.000000e+00> : vector<16x16xf32>
    %65 = tpu.matmul %64, %51, %cst_24 {dimension_numbers = #tpu.dot_dimension_numbers<[1], [0], [0], [1], [0, 0, 1, 1], [], []>} : vector<16x16xf32>, vector<16x16xf32>, vector<16x16xf32> -> vector<16x16xf32>
    %66 = vector.extract_strided_slice %65 {offsets = [0, 0], sizes = [8, 16], strides = [1, 1]} : vector<16x16xf32> to vector<8x16xf32>
    %c8 = arith.constant 8 : index
    %c0_25 = arith.constant 0 : index
    %67 = vector.load %arg7[%c8, %c0_25] : memref<16x64xf32, #tpu.memory_space<vmem>>, vector<8x16xf32>
    tpu.vector_store %arg7[%c8, %c0_25], %66 {strides = array<i32>} : memref<16x64xf32, #tpu.memory_space<vmem>>, vector<8x16xf32>,
    %68 = vector.extract_strided_slice %65 {offsets = [8, 0], sizes = [8, 16], strides = [1, 1]} : vector<16x16xf32> to vector<8x16xf32>
    %c8_26 = arith.constant 8 : index
    %c16_27 = arith.constant 16 : index
    %69 = vector.load %arg7[%c8_26, %c16_27] : memref<16x64xf32, #tpu.memory_space<vmem>>, vector<8x16xf32>
    tpu.vector_store %arg7[%c8_26, %c16_27], %68 {strides = array<i32>} : memref<16x64xf32, #tpu.memory_space<vmem>>, vector<8x16xf32>,
    %70 = vector.extract_strided_slice %49 {offsets = [0, 16], sizes = [16, 16], strides = [1, 1]} : vector<16x64xf32> to vector<16x16xf32>
    %71 = vector.extract_strided_slice %49 {offsets = [0, 48], sizes = [16, 16], strides = [1, 1]} : vector<16x64xf32> to vector<16x16xf32>
    %72 = vector.extract_strided_slice %48 {offsets = [0, 32], sizes = [8, 16], strides = [1, 1]} : vector<8x64xf32> to vector<8x16xf32>
    %73 = vector.extract_strided_slice %48 {offsets = [0, 48], sizes = [8, 16], strides = [1, 1]} : vector<8x64xf32> to vector<8x16xf32>
    %74 = tpu.concatenate %72, %73 in 0 : vector<8x16xf32>, vector<8x16xf32> -> vector<16x16xf32>
    %cst_28 = arith.constant dense<0.000000e+00> : vector<16x16xf32>
    %75 = tpu.matmul %74, %70, %cst_28 {dimension_numbers = #tpu.dot_dimension_numbers<[1], [1], [0], [0], [0, 0, 1, 0], [], []>} : vector<16x16xf32>, vector<16x16xf32>, vector<16x16xf32> -> vector<16x16xf32>
    %cst_29 = arith.constant dense<0xFF800000> : vector<16xf32>
    %76 = vector.multi_reduction <maximumf>, %75, %cst_29 [1] : vector<16x16xf32> to vector<16xf32>
    %77 = vector.shape_cast %76 : vector<16xf32> to vector<16x1xf32>
    %78 = vector.broadcast %77 : vector<16x1xf32> to vector<16x16xf32>
    %79 = arith.subf %75, %78 : vector<16x16xf32>
    %80 = math.exp %79 : vector<16x16xf32>
    %cst_30 = arith.constant dense<0.000000e+00> : vector<16xf32>
    %81 = vector.multi_reduction <add>, %80, %cst_30 [1] : vector<16x16xf32> to vector<16xf32>
    %82 = vector.shape_cast %81 : vector<16xf32> to vector<16x1xf32>
    %83 = vector.broadcast %82 : vector<16x1xf32> to vector<16x16xf32>
    %84 = arith.divf %80, %83 : vector<16x16xf32>
    %cst_31 = arith.constant dense<0.000000e+00> : vector<16x16xf32>
    %85 = tpu.matmul %84, %71, %cst_31 {dimension_numbers = #tpu.dot_dimension_numbers<[1], [0], [0], [1], [0, 0, 1, 1], [], []>} : vector<16x16xf32>, vector<16x16xf32>, vector<16x16xf32> -> vector<16x16xf32>
    %86 = vector.extract_strided_slice %85 {offsets = [0, 0], sizes = [8, 16], strides = [1, 1]} : vector<16x16xf32> to vector<8x16xf32>
    %c8_32 = arith.constant 8 : index
    %c32_33 = arith.constant 32 : index
    %87 = vector.load %arg7[%c8_32, %c32_33] : memref<16x64xf32, #tpu.memory_space<vmem>>, vector<8x16xf32>
    tpu.vector_store %arg7[%c8_32, %c32_33], %86 {strides = array<i32>} : memref<16x64xf32, #tpu.memory_space<vmem>>, vector<8x16xf32>,
    %88 = vector.extract_strided_slice %85 {offsets = [8, 0], sizes = [8, 16], strides = [1, 1]} : vector<16x16xf32> to vector<8x16xf32>
    %c8_34 = arith.constant 8 : index
    %c48_35 = arith.constant 48 : index
    %89 = vector.load %arg7[%c8_34, %c48_35] : memref<16x64xf32, #tpu.memory_space<vmem>>, vector<8x16xf32>
    tpu.vector_store %arg7[%c8_34, %c48_35], %88 {strides = array<i32>} : memref<16x64xf32, #tpu.memory_space<vmem>>, vector<8x16xf32>,
    %c0_36 = arith.constant 0 : index
    %c0_37 = arith.constant 0 : index
    %90 = vector.load %arg7[%c0_36, %c0_37] : memref<16x64xf32, #tpu.memory_space<vmem>>, vector<16x64xf32>
    %c0_38 = arith.constant 0 : index
    %c0_39 = arith.constant 0 : index
    %91 = vector.load %arg4[%c0_38, %c0_39] : memref<64x32xf32, #tpu.memory_space<vmem>>, vector<64x32xf32>
    %cst_40 = arith.constant dense<0.000000e+00> : vector<16x32xf32>
    %92 = tpu.matmul %90, %91, %cst_40 {dimension_numbers = #tpu.dot_dimension_numbers<[1], [0], [0], [1], [0, 0, 1, 1], [], []>} : vector<16x64xf32>, vector<64x32xf32>, vector<16x32xf32> -> vector<16x32xf32>
    %c0_41 = arith.constant 0 : index
    %c0_42 = arith.constant 0 : index
    %93 = vector.load %arg5[%c0_41, %c0_42] : memref<1x32xf32, #tpu.memory_space<vmem>>, vector<1x32xf32>
    %94 = vector.broadcast %93 : vector<1x32xf32> to vector<16x32xf32>
    %95 = arith.addf %92, %94 : vector<16x32xf32>
    %c0_43 = arith.constant 0 : index
    %c0_44 = arith.constant 0 : index
    %96 = vector.load %arg6[%c0_43, %c0_44] : memref<16x32xf32, #tpu.memory_space<vmem>>, vector<16x32xf32>
    tpu.vector_store %arg6[%c0_43, %c0_44], %95 {strides = array<i32>} : memref<16x32xf32, #tpu.memory_space<vmem>>, vector<16x32xf32>,
    return
  }
}

</mosaic_0001>

<bundles_post_ra>
// kernel: _gqa_attention_forward_impl.1
= control target key start
LH: loop header
LB: loop body
LE: loop exit
PB: predicated region body
PF: predicated region fallthrough
CT: control target
= control target key end

     0   :  { %11 = vsyncpa [#allocation4], 0  ;;  %s1680_s0 = inlined_call_operand.hbm [shape: f32[16,32], index: 0, kind: input, shape index: {}]   ;;  %s1681_s1 = inlined_call_operand.vmem [shape: f32[32,24], index: 1, kind: input, shape index: {}]   ;;  %s1682_s2 = inlined_call_operand.vmem [shape: f32[32,64], index: 2, kind: input, shape index: {}]   ;;  %s1683_s3 = inlined_call_operand.vmem [shape: f32[24,64], index: 3, kind: input, shape index: {}]   ;;  %s1684_s4 = inlined_call_operand.vmem [shape: f32[64,32], index: 4, kind: input, shape index: {}]   ;;  %s1685_s5 = inlined_call_operand.vmem [shape: f32[1,32], index: 5, kind: input, shape index: {}]   ;;  %s1686_s6 = inlined_call_operand.hbm [shape: f32[16,32], index: 6, kind: output, shape index: {}]  }
   0x1   :  { %12 = vsyncpa [#allocation5], 0  ;;  %s1451_s21 = smov [#allocation3]  }
   0x2   :  { %s18_s22 = sshll.u32 %s1451_s21, 4  ;;  %s19_s22 = int_to_ptr.vmem [resolvable:$true] %s18_s22 }
   0x3   :  { %s1415_s23 = scalar_lea.vmem %s19_s22, 256  ;;  %p1420_p1 = scmp.lt.s32.totalorder %s19_s22, %s19_s22 }
   0x4   :  { %p1416_p0 = scmp.ne.s32.totalorder %s19_s22, %s1415_s23  ;;  %p1421_p2 = scmp.lt.s32.totalorder %s1415_s23, %s1415_s23 }
   0x6   :  { %p1422_p3 = por %p1421_p2, %p1420_p1 }
   0x8   :  { %p1423_p4 = pnand %p1422_p3, %p1416_p0 }
   0xa   :  { %1426 = shalt.err (!%p1423_p4)
}
   0xb   :  { %s1452_s24 = smov 128   ;;  %s1453_s25 = smov 8  }
   0xc   :  { %24 = dma.hbm_to_vmem [thread:$0]  %s1680_s0, 256, %s19_s22, [#allocation4], %s1452_s24, %s1452_s24, %s1453_s25  }
   0xd   :  { %1447 = dma.done.wait [#allocation4], 256  }
   0xe   :  { %1448 = vsyncadd [#allocation4], 4294967040  ;;  %vm48_vm0 = vcmask 261120   ;;  %v47_v0 = vld [vmem:[%s1682_s2 + $0x18] sm:$0xff]  ;;  %v46_v1 = vld [vmem:[%s1682_s2 + $0x10] sm:$0xff]  ;;  %vm133_vm1 = vcmask 195584  }
   0xf   :  { %1267 = vmatprep.subr.mxu0 %v47_v0  ;;  %v38_v2 = vld [vmem:[#allocation3] sm:$0xff]  ;;  %v45_v3 = vld [vmem:[%s1682_s2 + $0x8] sm:$0xff]  ;;  %v44_v6 = vld [vmem:[%s1682_s2] sm:$0xff]  ;;  %vm234_vm2 = vcmask 130048   ;;  %s1454_s23 = smov 112   ;;  %s1456_s26 = smov 80  }
  0x10   :  { %1268 = vmatpush3.msra.mxu0 %v47_v0  ;;  %1275 = vmatprep.mubr.msk.f32.mxu0 %vm48_vm0, %v38_v2  ;;  %v132_v4 = vld [vmem:[%s1683_s3 + $0x10] sm:$0xff]  ;;  %v131_v5 = vld [vmem:[%s1683_s3 + $0x8] sm:$0xff]  ;;  %v130_v7 = vld [vmem:[%s1683_s3] sm:$0xff]  ;;  %s1457_s27 = smov 16   ;;  %vm434_vm3 = vcmask 261248   ;;  %s1458_s15 = smov 32  }
  0x11   :  { %1269 = vmatprep.subr.mxu0 %v46_v1  ;;  %1278 = vmatprep.subr.mxu1 %v132_v4  ;;  %v39_v8 = vld [vmem:[#allocation3 + $0x8] sm:$0xff]  ;;  %v40_v9 = vld [vmem:[%s1681_s1] sm:$0xff]  ;;  %v41_v10 = vld [vmem:[%s1681_s1 + $0x8] sm:$0xff]  ;;  %s1459_s20 = smov 48   ;;  %vm640_vm4 = vcmask 392448   ;;  %vm646_vm5 = vcmask 523648  }
  0x12   :  { %1270 = vmatpush3.msra.mxu0 %v46_v1  ;;  %1279 = vmatpush3.msra.mxu1 %v132_v4  ;;  %v42_v11 = vld [vmem:[%s1681_s1 + $0x10] sm:$0xff]  ;;  %v43_v12 = vld [vmem:[%s1681_s1 + $0x18] sm:$0xff]  ;;  %s1455_s1 = smov 96   ;;  %vm1078_vm6 = vcmask 523264   ;;  %s1460_s3 = smov [#allocation6]  }
  0x13   :  { %1271 = vmatprep.subr.mxu0 %v45_v3  ;;  %1280 = vmatprep.subr.mxu1 %v131_v5  ;;  %s1167_s21 = sshll.u32 %s1460_s3, 4  ;;  %s1168_s21 = int_to_ptr.vmem [resolvable:$true] %s1167_s21 }
  0x14   :  { %1272 = vmatpush3.msra.mxu0 %v45_v3  ;;  %1281 = vmatpush3.msra.mxu1 %v131_v5  ;;  %s1427_s22 = scalar_lea.vmem %s1168_s21, 256  ;;  %p1432_p6 = scmp.lt.s32.totalorder %s1168_s21, %s1168_s21 }
  0x15   :  { %1273 = vmatprep.subr.mxu0 %v44_v6  ;;  %1282 = vmatprep.subr.mxu1 %v130_v7  ;;  %p1428_p5 = scmp.ne.s32.totalorder %s1168_s21, %s1427_s22  ;;  %p1433_p7 = scmp.lt.s32.totalorder %s1427_s22, %s1427_s22 }
  0x16   :  { %1274 = vmatpush3.msra.mxu0 %v44_v6  ;;  %1283 = vmatpush3.msra.mxu1 %v130_v7 }
  0x17   :  { %1276 = vmatmul.mubr.msk.f32.vlgmr.msra.gmra.mxu0 %vm48_vm0, %v39_v8  ;;  %1284 = vmatprep.mubr.msk.f32.mxu1 %vm133_vm1, %v40_v9  ;;  %p1434_p8 = por %p1433_p7, %p1432_p6 }
  0x18   :  { %1285 = vmatmul.mubr.msk.f32.vlgmr.msra.gmra.mxu1 %vm133_vm1, %v41_v10 }
  0x19   :  { %1287 = vmatprep.mubr.msk.f32.mxu1 %vm133_vm1, %v42_v11  ;;  %p1435_p9 = pnand %p1434_p8, %p1428_p5 }
  0x1c   :  { %1288 = vmatmul.mubr.msk.f32.gmra.mxu1 %vm133_vm1, %v43_v12 }
  0xd7   :  { %v1537_v13 = vpop.f32.mrf.mxu0 }
  0xd8   :  { %v1539_v14 = vpop.f32.mrf.mxu1 }
  0xd9   :  { %v121_v15 = vpop.f32.mrf.mxu0  ;;  %1290 = vmatprep.subr.msk.mxu1 %vm234_vm2, %v1539_v14 }
  0xda   :  { %232 = vrot.lane.b32.xlu0 %v121_v15, %s1454_s23  ;;  %1294 = vmatprep.mubr.msk.f32.mxu1 %vm234_vm2, %v121_v15  ;;  %v1545_v16 = vpop.f32.mrf.mxu1 }
  0xdb   :  { %1291 = vmatpush3.xpose.msk.msra.mxu1 %vm234_vm2, %v1539_v14 }
  0xdc   :  { %1292 = vmatprep.subr.msk.mxu1 %vm234_vm2, %v1545_v16  ;;  %v1554_v18 = vpop.f32.mrf.mxu1 }
  0xde   :  { %v1556_v19 = vpop.f32.mrf.mxu1 }
  0xdf   :  { %1293 = vmatpush3.xpose.msk.msra.mxu1 %vm234_vm2, %v1545_v16 }
 0x14c   :  { %v233_v17 = vpop.permute.xlu0 %232 }
 0x14d   :  { %1295 = vmatmul.mubr.msk.f32.vlgmr.msra.gmra.mxu1 %vm234_vm2, %v233_v17 }
 0x20d   :  { %v1296_v20 = vpop.f32.mrf.mxu1 }
 0x20e   :  { %v323_v21 = vsel %vm234_vm2, %v1296_v20, -inf }
 0x20f   :  { %324 = vmax.xlane.f32.xlu1 %v323_v21  ;;  %v311_v22 = vpop.f32.mrf.mxu1 }
 0x210   :  { %v320_v23 = vsel %vm234_vm2, %v311_v22, -inf }
 0x211   :  { %321 = vmax.xlane.f32.xlu0 %v320_v23 }
 0x220   :  { %344 = vrot.lane.b32.xlu1 %v1539_v14, %s1455_s1 }
 0x224   :  { %342 = vrot.lane.b32.xlu1 %v1545_v16, %s1455_s1 }
 0x227   :  { %440 = vrot.lane.b32.xlu0 %v1545_v16, %s1454_s23 }
 0x228   :  { %442 = vrot.lane.b32.xlu1 %v1539_v14, %s1454_s23 }
 0x298   :  { %v325_v24 = vpop.xlane.xlu1 %324 }
 0x299   :  { %v327_v25 = vsub.f32 %v1296_v20, %v325_v24 }
 0x29a   :  { %v322_v26 = vpop.xlane.xlu0 %321 }
 0x29b   :  { %v330_v27 = vmul.f32 1.442695, %v327_v25  ;;  %v326_v28 = vsub.f32 %v311_v22, %v322_v26 }
 0x29c   :  { %v345_v29 = vpop.permute.xlu1 %344 }
 0x29d   :  { %1375 = vpow2.f32 %v330_v27  ;;  %v328_v30 = vmul.f32 1.442695, %v326_v28  ;;  %1297 = vmatprep.subr.mxu0 %v345_v29 }
 0x29e   :  { %1298 = vmatpush3.msra.mxu0 %v345_v29  ;;  %v441_v44 = vpop.permute.xlu0 %440 }
 0x29f   :  { %1377 = vpow2.f32 %v328_v30 }
 0x2a0   :  { %v343_v31 = vpop.permute.xlu1 %342 }
 0x2a1   :  { %1299 = vmatprep.subr.mxu0 %v343_v31 }
 0x2a2   :  { %1300 = vmatpush3.msra.mxu0 %v343_v31 }
 0x2a4   :  { %v443_v32 = vpop.permute.xlu1 %442 }
 0x2a5   :  { %1304 = vmatprep.subr.msk.mxu0 %vm234_vm2, %v443_v32 }
 0x2aa   :  { %v1376_v33 = vpop.eup %1375 }
 0x2ab   :  { %v335_v34 = vsel %vm234_vm2, %v1376_v33, 0.0 }
 0x2ac   :  { %v1378_v35 = vpop.eup %1377  ;;  %336 = vadd.xlane.f32.xlu1 %v335_v34 }
 0x2ad   :  { %v332_v36 = vsel %vm234_vm2, %v1378_v35, 0.0 }
 0x2b0   :  { %333 = vadd.xlane.f32.xlu1 %v332_v36 }
 0x2c1   :  { %436 = vrot.lane.b32.xlu1 %v121_v15, %s1455_s1 }
 0x2c5   :  { %438 = vrot.lane.b32.xlu1 %v233_v17, %s1455_s1 }
 0x2c9   :  { %649 = vrot.lane.b32.xlu1 %v1537_v13, %s1454_s23 }
 0x335   :  { %v337_v37 = vpop.xlane.xlu1 %336 }
 0x336   :  { %1379 = vrcp.f32 %v337_v37 }
 0x339   :  { %v334_v38 = vpop.xlane.xlu1 %333 }
 0x33a   :  { %1381 = vrcp.f32 %v334_v38 }
 0x33d   :  { %v437_v43 = vpop.permute.xlu1 %436 }
 0x341   :  { %v439_v45 = vpop.permute.xlu1 %438 }
 0x343   :  { %v1380_v39 = vpop.eup %1379 }
 0x344   :  { %v341_v42 = vmul.f32 %v1380_v39, %v1376_v33 }
 0x345   :  { %v650_v46 = vpop.permute.xlu1 %649 }
 0x347   :  { %v1382_v40 = vpop.eup %1381 }
 0x348   :  { %v339_v41 = vmul.f32 %v1382_v40, %v1378_v35 }
 0x34a   :  { %1301 = vmatprep.mubr.msk.f32.mxu0 %vm234_vm2, %v339_v41 }
 0x34b   :  { %1302 = vmatmul.mubr.msk.f32.vlgmr.msra.gmra.mxu0 %vm234_vm2, %v341_v42 }
 0x34c   :  { %1305 = vmatpush3.xpose.msk.msra.mxu0 %vm234_vm2, %v443_v32  ;;  %1308 = vmatprep.mubr.msk.f32.mxu0 %vm234_vm2, %v437_v43 }
 0x34d   :  { %1306 = vmatprep.subr.msk.mxu0 %vm234_vm2, %v441_v44 }
 0x350   :  { %1307 = vmatpush3.xpose.msk.msra.mxu0 %vm234_vm2, %v441_v44 }
 0x351   :  { %1318 = vmatprep.subr.msk.mxu0 %vm234_vm2, %v1554_v18 }
 0x353   :  { %1309 = vmatmul.mubr.msk.f32.vlgmr.msra.gmra.mxu0 %vm234_vm2, %v439_v45 }
 0x354   :  { %1319 = vmatpush3.xpose.msk.msra.mxu0 %vm234_vm2, %v1554_v18  ;;  %1322 = vmatprep.mubr.msk.f32.mxu0 %vm234_vm2, %v1537_v13 }
 0x355   :  { %1320 = vmatprep.subr.msk.mxu0 %vm234_vm2, %v1556_v19 }
 0x358   :  { %1321 = vmatpush3.xpose.msk.msra.mxu0 %vm234_vm2, %v1556_v19 }
 0x35b   :  { %1323 = vmatmul.mubr.msk.f32.vlgmr.msra.gmra.mxu0 %vm234_vm2, %v650_v46 }
 0x40b   :  { %v1593_v47 = vpop.f32.mrf.mxu0 }
 0x40d   :  { %v420_v48 = vpop.f32.mrf.mxu0 }
 0x40e   :  { %429 = vst.msk [vmem:[#allocation2] sm:$0xff] %vm234_vm2, %v420_v48 }
 0x413   :  { %v1596_v49 = vpop.f32.mrf.mxu0 }
 0x414   :  { %v530_v2 = vsel %vm234_vm2, %v1596_v49, -inf }
 0x415   :  { %v518_v50 = vpop.f32.mrf.mxu0 }
 0x416   :  { %v527_v3 = vsel %vm234_vm2, %v518_v50, -inf }
 0x41b   :  { %v1324_v51 = vpop.f32.mrf.mxu0 }
 0x41c   :  { %v739_v52 = vsel %vm234_vm2, %v1324_v51, -inf }
 0x41d   :  { %740 = vmax.xlane.f32.xlu0 %v739_v52  ;;  %v727_v53 = vpop.f32.mrf.mxu0 }
 0x41e   :  { %v736_v54 = vsel %vm234_vm2, %v727_v53, -inf }
 0x41f   :  { %737 = vmax.xlane.f32.xlu1 %v736_v54 }
 0x430   :  { %760 = vrot.lane.b32.xlu1 %v1554_v18, %s1455_s1 }
 0x434   :  { %857 = vrot.lane.b32.xlu1 %v1554_v18, %s1454_s23 }
 0x438   :  { %855 = vrot.lane.b32.xlu1 %v1556_v19, %s1454_s23 }
 0x4a6   :  { %v741_v55 = vpop.xlane.xlu0 %740 }
 0x4a7   :  { %v743_v56 = vsub.f32 %v1324_v51, %v741_v55 }
 0x4a8   :  { %v738_v57 = vpop.xlane.xlu1 %737 }
 0x4a9   :  { %v746_v58 = vmul.f32 1.442695, %v743_v56  ;;  %v742_v59 = vsub.f32 %v727_v53, %v738_v57 }
 0x4ab   :  { %1383 = vpow2.f32 %v746_v58  ;;  %v744_v60 = vmul.f32 1.442695, %v742_v59  ;;  %v1070_v59 = vld [vmem:[%s1684_s4 + $0x38] sm:$0xff] }
 0x4ac   :  { %v761_v61 = vpop.permute.xlu1 %760 }
 0x4ad   :  { %1385 = vpow2.f32 %v744_v60  ;;  %1325 = vmatprep.subr.mxu0 %v761_v61  ;;  %v1069_v60 = vld [vmem:[%s1684_s4 + $0x30] sm:$0xff] }
 0x4ae   :  { %1326 = vmatpush3.msra.mxu0 %v761_v61  ;;  %v1068_v61 = vld [vmem:[%s1684_s4 + $0x28] sm:$0xff] }
 0x4b0   :  { %v858_v4 = vpop.permute.xlu1 %857 }
 0x4b4   :  { %v856_v5 = vpop.permute.xlu1 %855 }
 0x4b8   :  { %v1384_v62 = vpop.eup %1383 }
 0x4b9   :  { %v751_v63 = vsel %vm234_vm2, %v1384_v62, 0.0 }
 0x4ba   :  { %v1386_v0 = vpop.eup %1385  ;;  %752 = vadd.xlane.f32.xlu0 %v751_v63 }
 0x4bb   :  { %v748_v1 = vsel %vm234_vm2, %v1386_v0, 0.0 }
 0x4bc   :  { %749 = vadd.xlane.f32.xlu1 %v748_v1 }
 0x4cd   :  { %853 = vrot.lane.b32.xlu1 %v650_v46, %s1455_s1 }
 0x4d0   :  { %758 = vrot.lane.b32.xlu0 %v1556_v19, %s1455_s1 }
 0x4d4   :  { %851 = vrot.lane.b32.xlu0 %v1537_v13, %s1455_s1 }
 0x4f1   :  { %531 = vmax.xlane.f32.xlu1 %v530_v2  ;;  %v1065_v2 = vld [vmem:[%s1684_s4 + $0x10] sm:$0xff] }
 0x4f3   :  { %528 = vmax.xlane.f32.xlu0 %v527_v3  ;;  %v1064_v3 = vld [vmem:[%s1684_s4 + $0x8] sm:$0xff] }
 0x543   :  { %v753_v6 = vpop.xlane.xlu0 %752 }
 0x544   :  { %1387 = vrcp.f32 %v753_v6 }
 0x545   :  { %v750_v7 = vpop.xlane.xlu1 %749 }
 0x546   :  { %1389 = vrcp.f32 %v750_v7 }
 0x547   :  { %v759_v8 = vpop.permute.xlu0 %758 }
 0x548   :  { %1327 = vmatprep.subr.mxu0 %v759_v8 }
 0x549   :  { %1328 = vmatpush3.msra.mxu0 %v759_v8  ;;  %v854_v15 = vpop.permute.xlu1 %853 }
 0x54a   :  { %1332 = vmatprep.subr.msk.mxu0 %vm234_vm2, %v858_v4 }
 0x54b   :  { %v852_v13 = vpop.permute.xlu0 %851 }
 0x551   :  { %v1388_v9 = vpop.eup %1387 }
 0x552   :  { %v757_v12 = vmul.f32 %v1388_v9, %v1384_v62  ;;  %v1067_v62 = vld [vmem:[%s1684_s4 + $0x20] sm:$0xff] }
 0x553   :  { %v1390_v10 = vpop.eup %1389 }
 0x554   :  { %v755_v11 = vmul.f32 %v1390_v10, %v1386_v0  ;;  %v1066_v0 = vld [vmem:[%s1684_s4 + $0x18] sm:$0xff] }
 0x556   :  { %1329 = vmatprep.mubr.msk.f32.mxu0 %vm234_vm2, %v755_v11 }
 0x557   :  { %1330 = vmatmul.mubr.msk.f32.vlgmr.msra.gmra.mxu0 %vm234_vm2, %v757_v12 }
 0x558   :  { %1333 = vmatpush3.xpose.msk.msra.mxu0 %vm234_vm2, %v858_v4  ;;  %1336 = vmatprep.mubr.msk.f32.mxu0 %vm234_vm2, %v852_v13  ;;  %v1063_v4 = vld [vmem:[%s1684_s4] sm:$0xff] }
 0x559   :  { %1334 = vmatprep.subr.msk.mxu0 %vm234_vm2, %v856_v5  ;;  %v1209_v13 = vld [vmem:[%s1685_s5] ss:$0 sm:$0xff] }
 0x55c   :  { %1335 = vmatpush3.xpose.msk.msra.mxu0 %vm234_vm2, %v856_v5 }
 0x55f   :  { %1337 = vmatmul.mubr.msk.f32.vlgmr.msra.gmra.mxu0 %vm234_vm2, %v854_v15 }
 0x57a   :  { %v532_v24 = vpop.xlane.xlu1 %531 }
 0x57b   :  { %v534_v25 = vsub.f32 %v1596_v49, %v532_v24 }
 0x57c   :  { %v529_v17 = vpop.xlane.xlu0 %528 }
 0x57d   :  { %v533_v20 = vsub.f32 %v518_v50, %v529_v17  ;;  %v537_v26 = vmul.f32 1.442695, %v534_v25 }
 0x57f   :  { %v535_v21 = vmul.f32 1.442695, %v533_v20 }
 0x581   :  { %1391 = vpow2.f32 %v535_v21 }
 0x582   :  { %1393 = vpow2.f32 %v537_v26 }
 0x58e   :  { %v1392_v22 = vpop.eup %1391 }
 0x58f   :  { %v539_v23 = vsel %vm234_vm2, %v1392_v22, 0.0 }
 0x590   :  { %540 = vadd.xlane.f32.xlu1 %v539_v23 }
 0x5a1   :  { %551 = vrot.lane.b32.xlu1 %v1539_v14, %s1456_s26 }
 0x5a5   :  { %966 = vrot.lane.b32.xlu1 %v1554_v18, %s1456_s26  ;;  %v1394_v18 = vpop.eup %1393 }
 0x5a6   :  { %v542_v36 = vsel %vm234_vm2, %v1394_v18, 0.0 }
 0x617   :  { %v1331_v27 = vpop.f32.mrf.mxu0 }
 0x619   :  { %v836_v28 = vpop.f32.mrf.mxu0  ;;  %v541_v29 = vpop.xlane.xlu1 %540 }
 0x61a   :  { %845 = vst.msk [vmem:[#allocation2 + $0x8] sm:$0xff] %vm234_vm2, %v836_v28  ;;  %1395 = vrcp.f32 %v541_v29 }
 0x61d   :  { %v552_v30 = vpop.permute.xlu1 %551 }
 0x61e   :  { %1311 = vmatprep.subr.mxu1 %v552_v30 }
 0x61f   :  { %v1338_v31 = vpop.f32.mrf.mxu0  ;;  %1312 = vmatpush3.msra.mxu1 %v552_v30 }
 0x620   :  { %v945_v33 = vsel %vm234_vm2, %v1338_v31, -inf }
 0x621   :  { %v933_v32 = vpop.f32.mrf.mxu0  ;;  %v967_v49 = vpop.permute.xlu1 %966 }
 0x622   :  { %v942_v14 = vsel %vm234_vm2, %v933_v32, -inf }
 0x623   :  { %943 = vmax.xlane.f32.xlu0 %v942_v14 }
 0x627   :  { %v1396_v34 = vpop.eup %1395  ;;  %946 = vmax.xlane.f32.xlu0 %v945_v33 }
 0x628   :  { %v546_v35 = vmul.f32 %v1396_v34, %v1392_v22 }
 0x62a   :  { %1315 = vmatprep.mubr.msk.f32.mxu1 %vm234_vm2, %v546_v35 }
 0x62b   :  { %543 = vadd.xlane.f32.xlu0 %v542_v36 }
 0x6ac   :  { %v944_v37 = vpop.xlane.xlu0 %943 }
 0x6ad   :  { %v948_v38 = vsub.f32 %v933_v32, %v944_v37 }
 0x6af   :  { %v950_v39 = vmul.f32 1.442695, %v948_v38 }
 0x6b0   :  { %v947_v40 = vpop.xlane.xlu0 %946 }
 0x6b1   :  { %1397 = vpow2.f32 %v950_v39  ;;  %v949_v41 = vsub.f32 %v1338_v31, %v947_v40 }
 0x6b3   :  { %v952_v42 = vmul.f32 1.442695, %v949_v41 }
 0x6b4   :  { %v544_v48 = vpop.xlane.xlu0 %543 }
 0x6b5   :  { %1399 = vpow2.f32 %v952_v42 }
 0x6b6   :  { %1401 = vrcp.f32 %v544_v48 }
 0x6be   :  { %v1398_v43 = vpop.eup %1397 }
 0x6bf   :  { %v954_v44 = vsel %vm234_vm2, %v1398_v43, 0.0 }
 0x6c0   :  { %955 = vadd.xlane.f32.xlu1 %v954_v44 }
 0x6c2   :  { %v1400_v45 = vpop.eup %1399 }
 0x6c3   :  { %v957_v46 = vsel %vm234_vm2, %v1400_v45, 0.0  ;;  %v1402_v52 = vpop.eup %1401 }
 0x6c4   :  { %958 = vadd.xlane.f32.xlu0 %v957_v46  ;;  %v548_v54 = vmul.f32 %v1402_v52, %v1394_v18 }
 0x6d1   :  { %964 = vrot.lane.b32.xlu1 %v1556_v19, %s1456_s26 }
 0x6da   :  { %549 = vrot.lane.b32.xlu0 %v1545_v16, %s1456_s26 }
 0x6de   :  { %431 = vrot.lane.b32.xlu0 %v1593_v47, %s1457_s27 }
 0x6e2   :  { %847 = vrot.lane.b32.xlu0 %v1331_v27, %s1457_s27 }
 0x749   :  { %v956_v50 = vpop.xlane.xlu1 %955 }
 0x74a   :  { %1403 = vrcp.f32 %v956_v50 }
 0x74d   :  { %v959_v51 = vpop.xlane.xlu0 %958  ;;  %v965_v16 = vpop.permute.xlu1 %964 }
 0x74e   :  { %1405 = vrcp.f32 %v959_v51 }
 0x751   :  { %v550_v53 = vpop.permute.xlu0 %549 }
 0x752   :  { %1313 = vmatprep.subr.mxu1 %v550_v53 }
 0x753   :  { %1314 = vmatpush3.msra.mxu1 %v550_v53 }
 0x754   :  { %1316 = vmatmul.mubr.msk.f32.vlgmr.msra.gmra.mxu1 %vm234_vm2, %v548_v54  ;;  %1339 = vmatprep.subr.mxu1 %v967_v49 }
 0x755   :  { %1340 = vmatpush3.msra.mxu1 %v967_v49  ;;  %v432_v19 = vpop.permute.xlu0 %431 }
 0x756   :  { %435 = vst.msk [vmem:[#allocation2] sm:$0xff] %vm434_vm3, %v432_v19  ;;  %1341 = vmatprep.subr.mxu1 %v965_v16 }
 0x757   :  { %v1404_v47 = vpop.eup %1403  ;;  %1342 = vmatpush3.msra.mxu1 %v965_v16 }
 0x758   :  { %v961_v55 = vmul.f32 %v1404_v47, %v1398_v43  ;;  %1346 = vmatprep.subr.mxu1 %v1070_v59 }
 0x759   :  { %v848_v56 = vpop.permute.xlu0 %847 }
 0x75a   :  { %850 = vst.msk [vmem:[#allocation2 + $0x8] sm:$0xff] %vm434_vm3, %v848_v56  ;;  %1343 = vmatprep.mubr.msk.f32.mxu1 %vm234_vm2, %v961_v55 }
 0x75b   :  { %v1406_v57 = vpop.eup %1405 }
 0x75c   :  { %v963_v58 = vmul.f32 %v1406_v57, %v1400_v45 }
 0x75e   :  { %1344 = vmatmul.mubr.msk.f32.vlgmr.msra.gmra.mxu1 %vm234_vm2, %v963_v58 }
 0x75f   :  { %1347 = vmatpush3.msra.mxu1 %v1070_v59 }
 0x760   :  { %1348 = vmatprep.subr.mxu1 %v1069_v60 }
 0x761   :  { %1349 = vmatpush3.msra.mxu1 %v1069_v60 }
 0x762   :  { %1350 = vmatprep.subr.mxu1 %v1068_v61 }
 0x763   :  { %1351 = vmatpush3.msra.mxu1 %v1068_v61 }
 0x764   :  { %1352 = vmatprep.subr.mxu1 %v1067_v62 }
 0x765   :  { %1353 = vmatpush3.msra.mxu1 %v1067_v62 }
 0x766   :  { %1354 = vmatprep.subr.mxu1 %v1066_v0 }
 0x767   :  { %1355 = vmatpush3.msra.mxu1 %v1066_v0 }
 0x768   :  { %1356 = vmatprep.subr.mxu1 %v1065_v2 }
 0x769   :  { %1357 = vmatpush3.msra.mxu1 %v1065_v2 }
 0x76a   :  { %1358 = vmatprep.subr.mxu1 %v1064_v3 }
 0x76b   :  { %1359 = vmatpush3.msra.mxu1 %v1064_v3 }
 0x76c   :  { %1360 = vmatprep.subr.mxu1 %v1063_v4 }
 0x76d   :  { %1361 = vmatpush3.msra.mxu1 %v1063_v4 }
 0x814   :  { %v1317_v63 = vpop.f32.mrf.mxu1 }
 0x816   :  { %v627_v1 = vpop.f32.mrf.mxu1 }
 0x817   :  { %637 = vrot.lane.b32.xlu1 %v627_v1, %s1458_s15 }
 0x81b   :  { %643 = vrot.lane.b32.xlu1 %v1317_v63, %s1459_s20 }
 0x81e   :  { %v1345_v5 = vpop.f32.mrf.mxu1 }
 0x81f   :  { %1057 = vrot.lane.b32.xlu1 %v1345_v5, %s1459_s20 }
 0x820   :  { %v1042_v6 = vpop.f32.mrf.mxu1 }
 0x821   :  { %1052 = vrot.lane.b32.xlu0 %v1042_v6, %s1458_s15 }
 0x889   :  { %v638_v7 = vpop.permute.xlu1 %637 }
 0x88a   :  { %641 = vst.msk [vmem:[#allocation2] sm:$0xff] %vm640_vm4, %v638_v7 }
 0x88d   :  { %v644_v8 = vpop.permute.xlu1 %643 }
 0x88e   :  { %647 = vst.msk [vmem:[#allocation2] sm:$0xff] %vm646_vm5, %v644_v8 }
 0x891   :  { %v1058_v10 = vpop.permute.xlu1 %1057 }
 0x893   :  { %v1053_v9 = vpop.permute.xlu0 %1052 }
 0x894   :  { %1055 = vst.msk [vmem:[#allocation2 + $0x8] sm:$0xff] %vm640_vm4, %v1053_v9 }
 0x895   :  { %1060 = vst.msk [vmem:[#allocation2 + $0x8] sm:$0xff] %vm646_vm5, %v1058_v10  ;;  %v1061_v11 = vld [vmem:[#allocation2] sm:$0xff] }
 0x896   :  { %1362 = vmatprep.mubr.msk.f32.mxu1 %vm1078_vm6, %v1061_v11 }
 0x89c   :  { %v1062_v12 = vld [vmem:[#allocation2 + $0x8] sm:$0xff] }
 0x89d   :  { %1363 = vmatmul.mubr.msk.f32.vlgmr.msra.gmra.mxu1 %vm1078_vm6, %v1062_v12 }
 0x95d   :  { %v1364_v15 = vpop.f32.mrf.mxu1 }
 0x95e   :  { %v1157_v17 = vadd.f32 %v1364_v15, %v1209_v13 }
 0x95f   :  { %v1151_v20 = vpop.f32.mrf.mxu1 }
 0x960   :  { %1161 = vst.msk [vmem:[#allocation6 + $0x8] sm:$0xff] %vm48_vm0, %v1157_v17  ;;  %v1152_v21 = vadd.f32 %v1209_v13, %v1151_v20 }
 0x962   :  { %1160 = vst.msk [vmem:[#allocation6] sm:$0xff] %vm48_vm0, %v1152_v21 }
 0x963   :  { %1438 = shalt.err (!%p1435_p9)
}
 0x964   :  { %1173 = dma.vmem_to_hbm [thread:$0]  %s1168_s21, 256, %s1686_s6, [#allocation5], %s1452_s24, %s1452_s24, %s1453_s25  }
 0x965   :  { %1449 = dma.done.wait [#allocation5], 256  }
 0x966   :  { %1450 = vsyncadd [#allocation5], 4294967040 }
 0x967   :  { %1177 = vsyncpa [#allocation4], 1 }
 0x968   :  { %1178 = vsyncpa [#allocation5], 1 }

</bundles_post_ra>
